<compile_context>
chip_gen: v7x
topology: tpu7x:2x2x1
jax: 0.10.0
libtpu: 0.0.40
codegen_flags: <defaults>
</compile_context>

<pallas_src>
import jax
import jax.numpy as jnp
from jax.experimental import pallas as pl
from jax.experimental.pallas import tpu as pltpu

FEAT = 100      # original feature dim
LATENT = 10     # original latent dim
PAD = 128       # lane-dense padded width
MAX_TILE = 1024  # biggest batch tile (well inside default scoped VMEM)


def _round_up(n, m):
    return (n + m - 1) // m * m


def _choose_tile(batch):
    """Batch tile: one full-dim block for small batches; otherwise tiles of up
    to 1024 rows with grid >= 2 (shards across v7x's two TensorCores)."""
    if batch <= 64:
        return batch                      # single full-dim block (always legal)
    half = -(-batch // 2)                 # ceil(batch / 2) -> at least 2 tiles
    t = _round_up(half, 16)               # multiple of 16: safe for bf16 packing
    t = min(t, MAX_TILE, (batch // 16) * 16)
    return max(t, 16)


def phase1_kernel(
    # activations, one batch tile each, raw width FEAT (any float dtype)
    x_ref, xbar_ref, mask_ref,
    # packed parameters (resident across the grid)
    w_ref,      # [7, 128, 128] bf16: enc1, enc2, enc3, dec_x.l2, dec_x.l3, dec_m.l2, dec_m.l3
    b_ref,      # [7, 1, 128]   f32
    wdec1_ref,  # [128, 256]    bf16: concat(dec_x.l1, dec_m.l1) along output dim
    bdec1_ref,  # [1, 256]      f32
    # outputs, width FEAT
    xhat_ref, mhat_ref,
    # scratch: zero-padded 128-lane staging of x_tilde
    xt_ref,     # VMEM [tile, 128] f32
):
    f32 = jnp.float32
    mm_dtype = w_ref.dtype                # matmul input dtype (bf16)

    def lin(a, i):
        # a: (tile, 128) mm_dtype -> (tile, 128) f32 (MXU accumulates in f32)
        return jnp.dot(a, w_ref[i], preferred_element_type=f32) + b_ref[i]

    def relu_mm(t):                        # relu in f32, cast for next matmul
        return jnp.maximum(t, 0.0).astype(mm_dtype)

    def sigmoid(s):                        # exact sigmoid, single EUP tanh
        return 0.5 * jnp.tanh(0.5 * s) + 0.5

    # Mask mix in f32 on the VPU:  x*mask + x_bar*(1-mask) == x_bar + mask*(x-x_bar)
    x = x_ref[...].astype(f32)
    x_bar = xbar_ref[...].astype(f32)
    mask = mask_ref[...].astype(f32)
    x_tilde = x_bar + mask * (x - x_bar)

    # Pad to 128 lanes inside VMEM. Pad lanes must be zero (they hit zero
    # weight rows); re-zeroed every step so a megacore-split grid stays correct.
    tile = xt_ref.shape[0]
    xt_ref[:, FEAT:] = jnp.zeros((tile, PAD - FEAT), f32)
    xt_ref[:, :FEAT] = x_tilde
    xt = xt_ref[...].astype(mm_dtype)

    # Encoder: Linear+ReLU x3
    h = relu_mm(lin(xt, 0))
    h = relu_mm(lin(h, 1))
    z = relu_mm(lin(h, 2))

    # Fused first layer of both decoders: one [128,256] matmul, split at a
    # 128-lane boundary afterwards.
    d1 = jnp.maximum(
        jnp.dot(z, wdec1_ref[...], preferred_element_type=f32) + bdec1_ref[...],
        0.0,
    ).astype(mm_dtype)
    dx = d1[:, :PAD]
    dm = d1[:, PAD:]

    # Decoder for x_hat
    dx = relu_mm(lin(dx, 3))
    xhat_ref[...] = sigmoid(lin(dx, 4))[:, :FEAT].astype(xhat_ref.dtype)

    # Decoder for m_hat
    dm = relu_mm(lin(dm, 5))
    mhat_ref[...] = sigmoid(lin(dm, 6))[:, :FEAT].astype(mhat_ref.dtype)


def pack_params(params, weight_dtype=jnp.bfloat16):
    """Pad & pack the 18 raw params into 4 lane-dense arrays.

    params: (ew1, eb1, ew2, eb2, ew3, eb3, xw1, xb1, xw2, xb2, xw3, xb3,
             mw1, mb1, mw2, mb2, mw3, mb3) with weights [in, out], biases [out].
    Zero padding keeps padded lanes exactly zero through the network.
    Weights are stored in bf16 (MXU-native on all generations); biases stay f32.
    """
    (ew1, eb1, ew2, eb2, ew3, eb3,
     xw1, xb1, xw2, xb2, xw3, xb3,
     mw1, mb1, mw2, mb2, mw3, mb3) = params

    def pad_w(w):
        fi, fo = w.shape
        return jnp.pad(w, ((0, PAD - fi), (0, PAD - fo)))

    def pad_b(b):
        b = b.reshape(1, -1)
        return jnp.pad(b, ((0, 0), (0, PAD - b.shape[1])))

    w_stack = jnp.stack(
        [pad_w(w) for w in (ew1, ew2, ew3, xw2, xw3, mw2, mw3)]
    ).astype(weight_dtype)
    b_stack = jnp.stack(
        [pad_b(b) for b in (eb1, eb2, eb3, xb2, xb3, mb2, mb3)]
    ).astype(jnp.float32)
    w_dec1 = jnp.concatenate([pad_w(xw1), pad_w(mw1)], axis=1).astype(weight_dtype)
    b_dec1 = jnp.concatenate([pad_b(xb1), pad_b(mb1)], axis=1).astype(jnp.float32)
    return w_stack, b_stack, w_dec1, b_dec1


@jax.jit
def phase1_forward(x, x_bar, mask, packed):
    """x, x_bar, mask: [batch, 100] (bf16 recommended, f32 accepted).
    packed: output of pack_params.  Returns (x_hat, m_hat) in x.dtype."""
    w_stack, b_stack, w_dec1, b_dec1 = packed
    batch, feat = x.shape
    assert feat == FEAT

    tile_m = _choose_tile(batch)
    grid = (pl.cdiv(batch, tile_m),)       # partial last block handled by Pallas

    act_spec = pl.BlockSpec((tile_m, FEAT), lambda i: (i, 0))
    w_spec = pl.BlockSpec(w_stack.shape, lambda i: (0, 0, 0))
    b_spec = pl.BlockSpec(b_stack.shape, lambda i: (0, 0, 0))
    wd1_spec = pl.BlockSpec(w_dec1.shape, lambda i: (0, 0))
    bd1_spec = pl.BlockSpec(b_dec1.shape, lambda i: (0, 0))

    out_dtype = x.dtype

    # Advisory cost hint: 7 [*,128]x[128,128] matmuls + 1 [*,128]x[128,256].
    flops = 2 * batch * (7 * PAD * PAD + PAD * 2 * PAD)
    transcendentals = 2 * batch * PAD      # the two sigmoid/tanh epilogues
    bytes_accessed = int(
        5 * batch * FEAT * x.dtype.itemsize          # 3 inputs + 2 outputs
        + w_stack.size * w_stack.dtype.itemsize
        + b_stack.size * 4
        + w_dec1.size * w_dec1.dtype.itemsize
        + b_dec1.size * 4
    )
    cost = pl.CostEstimate(
        flops=flops, transcendentals=transcendentals, bytes_accessed=bytes_accessed
    )

    x_hat, m_hat = pl.pallas_call(
        phase1_kernel,
        out_shape=(
            jax.ShapeDtypeStruct((batch, FEAT), out_dtype),
            jax.ShapeDtypeStruct((batch, FEAT), out_dtype),
        ),
        grid=grid,
        in_specs=[act_spec, act_spec, act_spec, w_spec, b_spec, wd1_spec, bd1_spec],
        out_specs=(act_spec, act_spec),
        scratch_shapes=[pltpu.VMEM((tile_m, PAD), jnp.float32)],
        compiler_params=pltpu.CompilerParams(dimension_semantics=("parallel",)),
        cost_estimate=cost,
    )(x, x_bar, mask, w_stack, b_stack, w_dec1, b_dec1)

    return x_hat, m_hat


def init_params(key):
    """Deterministic init mimicking nn.Linear (weights [in,out], biases [out])."""
    dims = [
        # encoder
        (FEAT, FEAT), (FEAT, FEAT), (FEAT, LATENT),
        # decoder x
        (LATENT, FEAT), (FEAT, FEAT), (FEAT, FEAT),
        # decoder m
        (LATENT, FEAT), (FEAT, FEAT), (FEAT, FEAT),
    ]
    params = []
    for (fan_in, fan_out) in dims:
        key, kw, kb = jax.random.split(key, 3)
        bound = 1.0 / jnp.sqrt(fan_in)
        w = jax.random.uniform(kw, (fan_in, fan_out), jnp.float32, -bound, bound)
        b = jax.random.uniform(kb, (fan_out,), jnp.float32, -bound, bound)
        params.extend([w, b])
    return tuple(params)


def reference_forward(x, x_bar, mask, params):
    """Pure-JAX f32 reference (true module semantics) for correctness checking."""
    (ew1, eb1, ew2, eb2, ew3, eb3,
     xw1, xb1, xw2, xb2, xw3, xb3,
     mw1, mb1, mw2, mb2, mw3, mb3) = params
    relu = lambda t: jnp.maximum(t, 0.0)
    x_tilde = x * mask + x_bar * (1.0 - mask)
    h = relu(x_tilde @ ew1 + eb1)
    h = relu(h @ ew2 + eb2)
    z = relu(h @ ew3 + eb3)
    dx = relu(z @ xw1 + xb1)
    dx = relu(dx @ xw2 + xb2)
    x_hat = jax.nn.sigmoid(dx @ xw3 + xb3)
    dm = relu(z @ mw1 + mb1)
    dm = relu(dm @ mw2 + mb2)
    m_hat = jax.nn.sigmoid(dm @ mw3 + mb3)
    return x_hat, m_hat


if __name__ == "__main__":
    key = jax.random.PRNGKey(0)
    k_params, k_data = jax.random.split(key)

    params = init_params(k_params)
    packed = pack_params(params)

    # batch=8 exercises the single-tile latency path; batch=200 exercises the
    # multi-tile (grid=2, partial last block) path.
    for batch in (8, 200):
        kx, kxb, km = jax.random.split(jax.random.fold_in(k_data, batch), 3)
        x = jax.random.normal(kx, (batch, FEAT), jnp.float32)
        x_bar = jax.random.normal(kxb, (batch, FEAT), jnp.float32)
        mask = (jax.random.uniform(km, (batch, FEAT)) > 0.5).astype(jnp.float32)

        # bf16 at the HBM boundary (the mask is 0/1 so it is exact in bf16).
        xb, xbarb, maskb = (a.astype(jnp.bfloat16) for a in (x, x_bar, mask))

        x_hat, m_hat = jax.block_until_ready(phase1_forward(xb, xbarb, maskb, packed))

        # Correctness vs the pure-f32 reference (tolerance relaxed for bf16 I/O).
        x_hat_ref, m_hat_ref = reference_forward(x, x_bar, mask, params)
        assert x_hat.shape == (batch, FEAT) and m_hat.shape == (batch, FEAT)
        assert jnp.allclose(x_hat.astype(jnp.float32), x_hat_ref, atol=3e-2)
        assert jnp.allclose(m_hat.astype(jnp.float32), m_hat_ref, atol=3e-2)

    print("KERNEL_OK")
</pallas_src>

<mosaic_0001>
module attributes {stable_mosaic.version = 11 : i64} {
  func.func @phase1_kernel(%arg0: i32, %arg1: memref<8x100xbf16, #tpu.memory_space<vmem>>, %arg2: memref<8x100xbf16, #tpu.memory_space<vmem>>, %arg3: memref<8x100xbf16, #tpu.memory_space<vmem>>, %arg4: memref<7x128x128xbf16, #tpu.memory_space<vmem>>, %arg5: memref<7x1x128xf32, #tpu.memory_space<vmem>>, %arg6: memref<128x256xbf16, #tpu.memory_space<vmem>>, %arg7: memref<1x256xf32, #tpu.memory_space<vmem>>, %arg8: memref<8x100xbf16, #tpu.memory_space<vmem>>, %arg9: memref<8x100xbf16, #tpu.memory_space<vmem>>, %arg10: memref<8x128xf32, #tpu.memory_space<vmem>>) attributes {dimension_semantics = [#tpu.dimension_semantics<parallel>], iteration_bounds = array<i64: 1>, scalar_prefetch = 0 : i64, scratch_operands = 1 : i64, tpu.core_type = #tpu.core_type<tc>, window_params = [{transform_indices = @transform_0, window_bounds = array<i64: 8, 100>}, {transform_indices = @transform_1, window_bounds = array<i64: 8, 100>}, {transform_indices = @transform_2, window_bounds = array<i64: 8, 100>}, {pipeline_mode = #tpu.pipeline_mode<synchronous>, transform_indices = @transform_3, window_bounds = array<i64: 7, 128, 128>}, {pipeline_mode = #tpu.pipeline_mode<synchronous>, transform_indices = @transform_4, window_bounds = array<i64: 7, 1, 128>}, {pipeline_mode = #tpu.pipeline_mode<synchronous>, transform_indices = @transform_5, window_bounds = array<i64: 128, 256>}, {pipeline_mode = #tpu.pipeline_mode<synchronous>, transform_indices = @transform_6, window_bounds = array<i64: 1, 256>}, {transform_indices = @transform_7, window_bounds = array<i64: 8, 100>}, {transform_indices = @transform_8, window_bounds = array<i64: 8, 100>}]} {
    %c0 = arith.constant 0 : index
    %c0_0 = arith.constant 0 : index
    %0 = vector.load %arg1[%c0, %c0_0] : memref<8x100xbf16, #tpu.memory_space<vmem>>, vector<8x100xbf16>
    %1 = arith.extf %0 : vector<8x100xbf16> to vector<8x100xf32>
    %c0_1 = arith.constant 0 : index
    %c0_2 = arith.constant 0 : index
    %2 = vector.load %arg2[%c0_1, %c0_2] : memref<8x100xbf16, #tpu.memory_space<vmem>>, vector<8x100xbf16>
    %3 = arith.extf %2 : vector<8x100xbf16> to vector<8x100xf32>
    %c0_3 = arith.constant 0 : index
    %c0_4 = arith.constant 0 : index
    %4 = vector.load %arg3[%c0_3, %c0_4] : memref<8x100xbf16, #tpu.memory_space<vmem>>, vector<8x100xbf16>
    %5 = arith.extf %4 : vector<8x100xbf16> to vector<8x100xf32>
    %6 = arith.subf %1, %3 : vector<8x100xf32>
    %7 = arith.mulf %5, %6 : vector<8x100xf32>
    %8 = arith.addf %3, %7 : vector<8x100xf32>
    %cst = arith.constant 0.000000e+00 : f32
    %9 = vector.broadcast %cst : f32 to vector<8x28xf32>
    %c0_5 = arith.constant 0 : index
    %c100 = arith.constant 100 : index
    %10 = vector.load %arg10[%c0_5, %c100] : memref<8x128xf32, #tpu.memory_space<vmem>>, vector<8x28xf32>
    tpu.vector_store %arg10[%c0_5, %c100], %9 {strides = array<i32>} : memref<8x128xf32, #tpu.memory_space<vmem>>, vector<8x28xf32>,
    %c0_6 = arith.constant 0 : index
    %c0_7 = arith.constant 0 : index
    %11 = vector.load %arg10[%c0_6, %c0_7] : memref<8x128xf32, #tpu.memory_space<vmem>>, vector<8x100xf32>
    tpu.vector_store %arg10[%c0_6, %c0_7], %8 {strides = array<i32>} : memref<8x128xf32, #tpu.memory_space<vmem>>, vector<8x100xf32>,
    %c0_8 = arith.constant 0 : index
    %c0_9 = arith.constant 0 : index
    %12 = vector.load %arg10[%c0_8, %c0_9] : memref<8x128xf32, #tpu.memory_space<vmem>>, vector<8x128xf32>
    %13 = arith.truncf %12 : vector<8x128xf32> to vector<8x128xbf16>
    %c0_10 = arith.constant 0 : index
    %c0_11 = arith.constant 0 : index
    %c0_12 = arith.constant 0 : index
    %14 = vector.load %arg4[%c0_10, %c0_11, %c0_12] : memref<7x128x128xbf16, #tpu.memory_space<vmem>>, vector<1x128x128xbf16>
    %15 = vector.shape_cast %14 : vector<1x128x128xbf16> to vector<128x128xbf16>
    %cst_13 = arith.constant dense<0.000000e+00> : vector<8x128xf32>
    %16 = tpu.matmul %13, %15, %cst_13 {dimension_numbers = #tpu.dot_dimension_numbers<[1], [0], [0], [1], [0, 0, 1, 1], [], []>} : vector<8x128xbf16>, vector<128x128xbf16>, vector<8x128xf32> -> vector<8x128xf32>
    %c0_14 = arith.constant 0 : index
    %c0_15 = arith.constant 0 : index
    %c0_16 = arith.constant 0 : index
    %17 = vector.load %arg5[%c0_14, %c0_15, %c0_16] : memref<7x1x128xf32, #tpu.memory_space<vmem>>, vector<1x1x128xf32>
    %18 = vector.shape_cast %17 : vector<1x1x128xf32> to vector<1x128xf32>
    %19 = vector.broadcast %18 : vector<1x128xf32> to vector<8x128xf32>
    %20 = arith.addf %16, %19 : vector<8x128xf32>
    %cst_17 = arith.constant 0.000000e+00 : f32
    %21 = vector.broadcast %cst_17 : f32 to vector<8x128xf32>
    %22 = arith.maximumf %20, %21 : vector<8x128xf32>
    %23 = arith.truncf %22 : vector<8x128xf32> to vector<8x128xbf16>
    %c1 = arith.constant 1 : index
    %c0_18 = arith.constant 0 : index
    %c0_19 = arith.constant 0 : index
    %24 = vector.load %arg4[%c1, %c0_18, %c0_19] : memref<7x128x128xbf16, #tpu.memory_space<vmem>>, vector<1x128x128xbf16>
    %25 = vector.shape_cast %24 : vector<1x128x128xbf16> to vector<128x128xbf16>
    %cst_20 = arith.constant dense<0.000000e+00> : vector<8x128xf32>
    %26 = tpu.matmul %23, %25, %cst_20 {dimension_numbers = #tpu.dot_dimension_numbers<[1], [0], [0], [1], [0, 0, 1, 1], [], []>} : vector<8x128xbf16>, vector<128x128xbf16>, vector<8x128xf32> -> vector<8x128xf32>
    %c1_21 = arith.constant 1 : index
    %c0_22 = arith.constant 0 : index
    %c0_23 = arith.constant 0 : index
    %27 = vector.load %arg5[%c1_21, %c0_22, %c0_23] : memref<7x1x128xf32, #tpu.memory_space<vmem>>, vector<1x1x128xf32>
    %28 = vector.shape_cast %27 : vector<1x1x128xf32> to vector<1x128xf32>
    %29 = vector.broadcast %28 : vector<1x128xf32> to vector<8x128xf32>
    %30 = arith.addf %26, %29 : vector<8x128xf32>
    %cst_24 = arith.constant 0.000000e+00 : f32
    %31 = vector.broadcast %cst_24 : f32 to vector<8x128xf32>
    %32 = arith.maximumf %30, %31 : vector<8x128xf32>
    %33 = arith.truncf %32 : vector<8x128xf32> to vector<8x128xbf16>
    %c2 = arith.constant 2 : index
    %c0_25 = arith.constant 0 : index
    %c0_26 = arith.constant 0 : index
    %34 = vector.load %arg4[%c2, %c0_25, %c0_26] : memref<7x128x128xbf16, #tpu.memory_space<vmem>>, vector<1x128x128xbf16>
    %35 = vector.shape_cast %34 : vector<1x128x128xbf16> to vector<128x128xbf16>
    %cst_27 = arith.constant dense<0.000000e+00> : vector<8x128xf32>
    %36 = tpu.matmul %33, %35, %cst_27 {dimension_numbers = #tpu.dot_dimension_numbers<[1], [0], [0], [1], [0, 0, 1, 1], [], []>} : vector<8x128xbf16>, vector<128x128xbf16>, vector<8x128xf32> -> vector<8x128xf32>
    %c2_28 = arith.constant 2 : index
    %c0_29 = arith.constant 0 : index
    %c0_30 = arith.constant 0 : index
    %37 = vector.load %arg5[%c2_28, %c0_29, %c0_30] : memref<7x1x128xf32, #tpu.memory_space<vmem>>, vector<1x1x128xf32>
    %38 = vector.shape_cast %37 : vector<1x1x128xf32> to vector<1x128xf32>
    %39 = vector.broadcast %38 : vector<1x128xf32> to vector<8x128xf32>
    %40 = arith.addf %36, %39 : vector<8x128xf32>
    %cst_31 = arith.constant 0.000000e+00 : f32
    %41 = vector.broadcast %cst_31 : f32 to vector<8x128xf32>
    %42 = arith.maximumf %40, %41 : vector<8x128xf32>
    %43 = arith.truncf %42 : vector<8x128xf32> to vector<8x128xbf16>
    %c0_32 = arith.constant 0 : index
    %c0_33 = arith.constant 0 : index
    %44 = vector.load %arg6[%c0_32, %c0_33] : memref<128x256xbf16, #tpu.memory_space<vmem>>, vector<128x256xbf16>
    %cst_34 = arith.constant dense<0.000000e+00> : vector<8x256xf32>
    %45 = tpu.matmul %43, %44, %cst_34 {dimension_numbers = #tpu.dot_dimension_numbers<[1], [0], [0], [1], [0, 0, 1, 1], [], []>} : vector<8x128xbf16>, vector<128x256xbf16>, vector<8x256xf32> -> vector<8x256xf32>
    %c0_35 = arith.constant 0 : index
    %c0_36 = arith.constant 0 : index
    %46 = vector.load %arg7[%c0_35, %c0_36] : memref<1x256xf32, #tpu.memory_space<vmem>>, vector<1x256xf32>
    %47 = vector.broadcast %46 : vector<1x256xf32> to vector<8x256xf32>
    %48 = arith.addf %45, %47 : vector<8x256xf32>
    %cst_37 = arith.constant 0.000000e+00 : f32
    %49 = vector.broadcast %cst_37 : f32 to vector<8x256xf32>
    %50 = arith.maximumf %48, %49 : vector<8x256xf32>
    %51 = arith.truncf %50 : vector<8x256xf32> to vector<8x256xbf16>
    %52 = vector.extract_strided_slice %51 {offsets = [0, 0], sizes = [8, 128], strides = [1, 1]} : vector<8x256xbf16> to vector<8x128xbf16>
    %53 = vector.extract_strided_slice %51 {offsets = [0, 128], sizes = [8, 128], strides = [1, 1]} : vector<8x256xbf16> to vector<8x128xbf16>
    %c3 = arith.constant 3 : index
    %c0_38 = arith.constant 0 : index
    %c0_39 = arith.constant 0 : index
    %54 = vector.load %arg4[%c3, %c0_38, %c0_39] : memref<7x128x128xbf16, #tpu.memory_space<vmem>>, vector<1x128x128xbf16>
    %55 = vector.shape_cast %54 : vector<1x128x128xbf16> to vector<128x128xbf16>
    %cst_40 = arith.constant dense<0.000000e+00> : vector<8x128xf32>
    %56 = tpu.matmul %52, %55, %cst_40 {dimension_numbers = #tpu.dot_dimension_numbers<[1], [0], [0], [1], [0, 0, 1, 1], [], []>} : vector<8x128xbf16>, vector<128x128xbf16>, vector<8x128xf32> -> vector<8x128xf32>
    %c3_41 = arith.constant 3 : index
    %c0_42 = arith.constant 0 : index
    %c0_43 = arith.constant 0 : index
    %57 = vector.load %arg5[%c3_41, %c0_42, %c0_43] : memref<7x1x128xf32, #tpu.memory_space<vmem>>, vector<1x1x128xf32>
    %58 = vector.shape_cast %57 : vector<1x1x128xf32> to vector<1x128xf32>
    %59 = vector.broadcast %58 : vector<1x128xf32> to vector<8x128xf32>
    %60 = arith.addf %56, %59 : vector<8x128xf32>
    %cst_44 = arith.constant 0.000000e+00 : f32
    %61 = vector.broadcast %cst_44 : f32 to vector<8x128xf32>
    %62 = arith.maximumf %60, %61 : vector<8x128xf32>
    %63 = arith.truncf %62 : vector<8x128xf32> to vector<8x128xbf16>
    %c4 = arith.constant 4 : index
    %c0_45 = arith.constant 0 : index
    %c0_46 = arith.constant 0 : index
    %64 = vector.load %arg4[%c4, %c0_45, %c0_46] : memref<7x128x128xbf16, #tpu.memory_space<vmem>>, vector<1x128x128xbf16>
    %65 = vector.shape_cast %64 : vector<1x128x128xbf16> to vector<128x128xbf16>
    %cst_47 = arith.constant dense<0.000000e+00> : vector<8x128xf32>
    %66 = tpu.matmul %63, %65, %cst_47 {dimension_numbers = #tpu.dot_dimension_numbers<[1], [0], [0], [1], [0, 0, 1, 1], [], []>} : vector<8x128xbf16>, vector<128x128xbf16>, vector<8x128xf32> -> vector<8x128xf32>
    %c4_48 = arith.constant 4 : index
    %c0_49 = arith.constant 0 : index
    %c0_50 = arith.constant 0 : index
    %67 = vector.load %arg5[%c4_48, %c0_49, %c0_50] : memref<7x1x128xf32, #tpu.memory_space<vmem>>, vector<1x1x128xf32>
    %68 = vector.shape_cast %67 : vector<1x1x128xf32> to vector<1x128xf32>
    %69 = vector.broadcast %68 : vector<1x128xf32> to vector<8x128xf32>
    %70 = arith.addf %66, %69 : vector<8x128xf32>
    %cst_51 = arith.constant 5.000000e-01 : f32
    %71 = vector.broadcast %cst_51 : f32 to vector<8x128xf32>
    %72 = arith.mulf %71, %70 : vector<8x128xf32>
    %73 = math.tanh %72 : vector<8x128xf32>
    %cst_52 = arith.constant 5.000000e-01 : f32
    %74 = vector.broadcast %cst_52 : f32 to vector<8x128xf32>
    %75 = arith.mulf %74, %73 : vector<8x128xf32>
    %cst_53 = arith.constant 5.000000e-01 : f32
    %76 = vector.broadcast %cst_53 : f32 to vector<8x128xf32>
    %77 = arith.addf %75, %76 : vector<8x128xf32>
    %78 = vector.extract_strided_slice %77 {offsets = [0, 0], sizes = [8, 100], strides = [1, 1]} : vector<8x128xf32> to vector<8x100xf32>
    %79 = arith.truncf %78 : vector<8x100xf32> to vector<8x100xbf16>
    %c0_54 = arith.constant 0 : index
    %c0_55 = arith.constant 0 : index
    %80 = vector.load %arg8[%c0_54, %c0_55] : memref<8x100xbf16, #tpu.memory_space<vmem>>, vector<8x100xbf16>
    tpu.vector_store %arg8[%c0_54, %c0_55], %79 {strides = array<i32>} : memref<8x100xbf16, #tpu.memory_space<vmem>>, vector<8x100xbf16>,
    %c5 = arith.constant 5 : index
    %c0_56 = arith.constant 0 : index
    %c0_57 = arith.constant 0 : index
    %81 = vector.load %arg4[%c5, %c0_56, %c0_57] : memref<7x128x128xbf16, #tpu.memory_space<vmem>>, vector<1x128x128xbf16>
    %82 = vector.shape_cast %81 : vector<1x128x128xbf16> to vector<128x128xbf16>
    %cst_58 = arith.constant dense<0.000000e+00> : vector<8x128xf32>
    %83 = tpu.matmul %53, %82, %cst_58 {dimension_numbers = #tpu.dot_dimension_numbers<[1], [0], [0], [1], [0, 0, 1, 1], [], []>} : vector<8x128xbf16>, vector<128x128xbf16>, vector<8x128xf32> -> vector<8x128xf32>
    %c5_59 = arith.constant 5 : index
    %c0_60 = arith.constant 0 : index
    %c0_61 = arith.constant 0 : index
    %84 = vector.load %arg5[%c5_59, %c0_60, %c0_61] : memref<7x1x128xf32, #tpu.memory_space<vmem>>, vector<1x1x128xf32>
    %85 = vector.shape_cast %84 : vector<1x1x128xf32> to vector<1x128xf32>
    %86 = vector.broadcast %85 : vector<1x128xf32> to vector<8x128xf32>
    %87 = arith.addf %83, %86 : vector<8x128xf32>
    %cst_62 = arith.constant 0.000000e+00 : f32
    %88 = vector.broadcast %cst_62 : f32 to vector<8x128xf32>
    %89 = arith.maximumf %87, %88 : vector<8x128xf32>
    %90 = arith.truncf %89 : vector<8x128xf32> to vector<8x128xbf16>
    %c6 = arith.constant 6 : index
    %c0_63 = arith.constant 0 : index
    %c0_64 = arith.constant 0 : index
    %91 = vector.load %arg4[%c6, %c0_63, %c0_64] : memref<7x128x128xbf16, #tpu.memory_space<vmem>>, vector<1x128x128xbf16>
    %92 = vector.shape_cast %91 : vector<1x128x128xbf16> to vector<128x128xbf16>
    %cst_65 = arith.constant dense<0.000000e+00> : vector<8x128xf32>
    %93 = tpu.matmul %90, %92, %cst_65 {dimension_numbers = #tpu.dot_dimension_numbers<[1], [0], [0], [1], [0, 0, 1, 1], [], []>} : vector<8x128xbf16>, vector<128x128xbf16>, vector<8x128xf32> -> vector<8x128xf32>
    %c6_66 = arith.constant 6 : index
    %c0_67 = arith.constant 0 : index
    %c0_68 = arith.constant 0 : index
    %94 = vector.load %arg5[%c6_66, %c0_67, %c0_68] : memref<7x1x128xf32, #tpu.memory_space<vmem>>, vector<1x1x128xf32>
    %95 = vector.shape_cast %94 : vector<1x1x128xf32> to vector<1x128xf32>
    %96 = vector.broadcast %95 : vector<1x128xf32> to vector<8x128xf32>
    %97 = arith.addf %93, %96 : vector<8x128xf32>
    %cst_69 = arith.constant 5.000000e-01 : f32
    %98 = vector.broadcast %cst_69 : f32 to vector<8x128xf32>
    %99 = arith.mulf %98, %97 : vector<8x128xf32>
    %100 = math.tanh %99 : vector<8x128xf32>
    %cst_70 = arith.constant 5.000000e-01 : f32
    %101 = vector.broadcast %cst_70 : f32 to vector<8x128xf32>
    %102 = arith.mulf %101, %100 : vector<8x128xf32>
    %cst_71 = arith.constant 5.000000e-01 : f32
    %103 = vector.broadcast %cst_71 : f32 to vector<8x128xf32>
    %104 = arith.addf %102, %103 : vector<8x128xf32>
    %105 = vector.extract_strided_slice %104 {offsets = [0, 0], sizes = [8, 100], strides = [1, 1]} : vector<8x128xf32> to vector<8x100xf32>
    %106 = arith.truncf %105 : vector<8x100xf32> to vector<8x100xbf16>
    %c0_72 = arith.constant 0 : index
    %c0_73 = arith.constant 0 : index
    %107 = vector.load %arg9[%c0_72, %c0_73] : memref<8x100xbf16, #tpu.memory_space<vmem>>, vector<8x100xbf16>
    tpu.vector_store %arg9[%c0_72, %c0_73], %106 {strides = array<i32>} : memref<8x100xbf16, #tpu.memory_space<vmem>>, vector<8x100xbf16>,
    return
  }
  func.func @transform_0(%arg0: i32) -> (i32, i32) {
    %c0_i32 = arith.constant 0 : i32
    %c0_i32_0 = arith.constant 0 : i32
    return %arg0, %c0_i32 : i32, i32
  }
  func.func @transform_1(%arg0: i32) -> (i32, i32) {
    %c0_i32 = arith.constant 0 : i32
    %c0_i32_0 = arith.constant 0 : i32
    return %arg0, %c0_i32 : i32, i32
  }
  func.func @transform_2(%arg0: i32) -> (i32, i32) {
    %c0_i32 = arith.constant 0 : i32
    %c0_i32_0 = arith.constant 0 : i32
    return %arg0, %c0_i32 : i32, i32
  }
  func.func @transform_3(%arg0: i32) -> (i32, i32, i32) {
    %c0_i32 = arith.constant 0 : i32
    %c0_i32_0 = arith.constant 0 : i32
    %c0_i32_1 = arith.constant 0 : i32
    %c0_i32_2 = arith.constant 0 : i32
    return %c0_i32, %c0_i32_0, %c0_i32_1 : i32, i32, i32
  }
  func.func @transform_4(%arg0: i32) -> (i32, i32, i32) {
    %c0_i32 = arith.constant 0 : i32
    %c0_i32_0 = arith.constant 0 : i32
    %c0_i32_1 = arith.constant 0 : i32
    %c0_i32_2 = arith.constant 0 : i32
    return %c0_i32, %c0_i32_0, %c0_i32_1 : i32, i32, i32
  }
  func.func @transform_5(%arg0: i32) -> (i32, i32) {
    %c0_i32 = arith.constant 0 : i32
    %c0_i32_0 = arith.constant 0 : i32
    %c0_i32_1 = arith.constant 0 : i32
    return %c0_i32, %c0_i32_0 : i32, i32
  }
  func.func @transform_6(%arg0: i32) -> (i32, i32) {
    %c0_i32 = arith.constant 0 : i32
    %c0_i32_0 = arith.constant 0 : i32
    %c0_i32_1 = arith.constant 0 : i32
    return %c0_i32, %c0_i32_0 : i32, i32
  }
  func.func @transform_7(%arg0: i32) -> (i32, i32) {
    %c0_i32 = arith.constant 0 : i32
    %c0_i32_0 = arith.constant 0 : i32
    return %arg0, %c0_i32 : i32, i32
  }
  func.func @transform_8(%arg0: i32) -> (i32, i32) {
    %c0_i32 = arith.constant 0 : i32
    %c0_i32_0 = arith.constant 0 : i32
    return %arg0, %c0_i32 : i32, i32
  }
}

</mosaic_0001>

<bundles_post_ra>
// kernel: phase1_forward.1
= control target key start
LH: loop header
LB: loop body
LE: loop exit
PB: predicated region body
PF: predicated region fallthrough
CT: control target
= control target key end

     0   :  { %14 = vsyncpa [#allocation4], 0  ;;  %s1850_s0 = inlined_call_operand.hbm [shape: bf16[8,100], index: 0, kind: input, shape index: {}]   ;;  %s1851_s1 = inlined_call_operand.hbm [shape: bf16[8,100], index: 1, kind: input, shape index: {}]   ;;  %s1852_s2 = inlined_call_operand.vmem [shape: bf16[8,100], index: 2, kind: input, shape index: {}]   ;;  %s1853_s3 = inlined_call_operand.hbm [shape: bf16[7,128,128], index: 3, kind: input, shape index: {}]   ;;  %s1854_s4 = inlined_call_operand.vmem [shape: f32[7,1,128], index: 4, kind: input, shape index: {}]   ;;  %s1855_s5 = inlined_call_operand.hbm [shape: bf16[128,256], index: 5, kind: input, shape index: {}]   ;;  %s1856_s6 = inlined_call_operand.vmem [shape: f32[1,256], index: 6, kind: input, shape index: {}]   ;;  %s1857_s7 = inlined_call_operand.hbm [shape: bf16[8,100], index: 7, kind: output, shape index: {0}]   ;;  %s1858_s8 = inlined_call_operand.hbm [shape: bf16[8,100], index: 8, kind: output, shape index: {1}]  }
   0x1   :  { %15 = vsyncpa [#allocation7], 0 }
   0x2   :  { %16 = vsyncpa [#allocation10], 0 }
   0x3   :  { %17 = vsyncpa [#allocation5], 0 }
   0x4   :  { %18 = vsyncpa [#allocation13], 0  ;;  %s1620_s27 = smov [#allocation6]   ;;  %s1621_s29 = smov [#allocation3]  }
   0x5   :  { %s35_s28 = sshll.u32 %s1620_s27, 4  ;;  %s25_s30 = sshll.u32 %s1621_s29, 4  ;;  %s36_s28 = int_to_ptr.vmem [resolvable:$true] %s35_s28  ;;  %s26_s30 = int_to_ptr.vmem [resolvable:$true] %s25_s30 }
   0x6   :  { %s1478_s11 = scalar_lea.hbm %s1851_s1, 64 }
   0x7   :  { %p1479_p0 = scmp.ne.s32.totalorder %s1851_s1, %s1478_s11  ;;  %p1482_p1 = scmp.lt.u32.totalorder %s1478_s11, %s1851_s1 }
   0x9   :  { %p1484_p2 = pnand %p1482_p1, %p1479_p0 }
   0xb   :  { %1487 = shalt.err (!%p1484_p2)
}
   0xc   :  { %s1488_s16 = scalar_lea.vmem %s36_s28, 64  ;;  %p1493_p4 = scmp.lt.s32.totalorder %s36_s28, %s36_s28 }
   0xd   :  { %p1489_p3 = scmp.ne.s32.totalorder %s36_s28, %s1488_s16  ;;  %p1494_p5 = scmp.lt.s32.totalorder %s1488_s16, %s1488_s16 }
   0xf   :  { %p1495_p6 = por %p1494_p5, %p1493_p4 }
  0x11   :  { %p1496_p7 = pnand %p1495_p6, %p1489_p3 }
  0x13   :  { %1499 = shalt.err (!%p1496_p7)
}
  0x14   :  { %38 = dma.hbm_to_vmem [thread:$0]  %s1851_s1, 64, %s36_s28, [#allocation7]  }
  0x15   :  { %s1500_s21 = scalar_lea.hbm %s1850_s0, 64 }
  0x16   :  { %p1501_p8 = scmp.ne.s32.totalorder %s1850_s0, %s1500_s21  ;;  %p1504_p9 = scmp.lt.u32.totalorder %s1500_s21, %s1850_s0 }
  0x18   :  { %p1506_p10 = pnand %p1504_p9, %p1501_p8 }
  0x1a   :  { %1509 = shalt.err (!%p1506_p10)
}
  0x1b   :  { %s1510_s26 = scalar_lea.vmem %s26_s30, 64  ;;  %p1515_p12 = scmp.lt.s32.totalorder %s26_s30, %s26_s30 }
  0x1c   :  { %p1511_p11 = scmp.ne.s32.totalorder %s26_s30, %s1510_s26  ;;  %p1516_p13 = scmp.lt.s32.totalorder %s1510_s26, %s1510_s26 }
  0x1e   :  { %p1517_p0 = por %p1516_p13, %p1515_p12 }
  0x20   :  { %p1518_p1 = pnand %p1517_p0, %p1511_p11 }
  0x22   :  { %1521 = shalt.err (!%p1518_p1)
}
  0x23   :  { %28 = dma.hbm_to_vmem [thread:$0]  %s1850_s0, 64, %s26_s30, [#allocation4]  }
  0x24   :  { %s1622_s28 = smov [#allocation8]   ;;  %s1522_s11 = scalar_lea.hbm %s1853_s3, 7168 }
  0x25   :  { %s46_s29 = sshll.u32 %s1622_s28, 4  ;;  %p1523_p2 = scmp.ne.s32.totalorder %s1853_s3, %s1522_s11  ;;  %s47_s29 = int_to_ptr.vmem [resolvable:$true] %s46_s29 }
  0x26   :  { %p1526_p3 = scmp.lt.u32.totalorder %s1522_s11, %s1853_s3 }
  0x28   :  { %p1528_p4 = pnand %p1526_p3, %p1523_p2 }
  0x2a   :  { %1531 = shalt.err (!%p1528_p4)
}
  0x2b   :  { %s1532_s16 = scalar_lea.vmem %s47_s29, 7168  ;;  %p1537_p6 = scmp.lt.s32.totalorder %s47_s29, %s47_s29 }
  0x2c   :  { %p1533_p5 = scmp.ne.s32.totalorder %s47_s29, %s1532_s16  ;;  %p1538_p7 = scmp.lt.s32.totalorder %s1532_s16, %s1532_s16 }
  0x2e   :  { %p1539_p8 = por %p1538_p7, %p1537_p6 }
  0x30   :  { %p1540_p9 = pnand %p1539_p8, %p1533_p5 }
  0x32   :  { %1543 = shalt.err (!%p1540_p9)
}
  0x33   :  { %s1623_s0 = smov 64   ;;  %s1624_s30 = smov 4  }
  0x34   :  { %52 = dma.hbm_to_vmem [thread:$0]  %s1853_s3, 7168, %s47_s29, [#allocation7], %s1623_s0, %s1623_s0, %s1624_s30  }
  0x35   :  { %s1625_s19 = smov [#allocation9]   ;;  %s1544_s23 = scalar_lea.hbm %s1855_s5, 2048 }
  0x36   :  { %s60_s20 = sshll.u32 %s1625_s19, 4  ;;  %p1545_p10 = scmp.ne.s32.totalorder %s1855_s5, %s1544_s23  ;;  %s61_s20 = int_to_ptr.vmem [resolvable:$true] %s60_s20 }
  0x37   :  { %p1548_p11 = scmp.lt.u32.totalorder %s1544_s23, %s1855_s5 }
  0x39   :  { %p1550_p12 = pnand %p1548_p11, %p1545_p10 }
  0x3b   :  { %1553 = shalt.err (!%p1550_p12)
}
  0x3c   :  { %s1554_s27 = scalar_lea.vmem %s61_s20, 2048  ;;  %p1559_p0 = scmp.lt.s32.totalorder %s61_s20, %s61_s20 }
  0x3d   :  { %p1555_p13 = scmp.ne.s32.totalorder %s61_s20, %s1554_s27  ;;  %p1560_p1 = scmp.lt.s32.totalorder %s1554_s27, %s1554_s27 }
  0x3f   :  { %p1561_p2 = por %p1560_p1, %p1559_p0 }
  0x41   :  { %p1562_p3 = pnand %p1561_p2, %p1555_p13 }
  0x43   :  { %1565 = shalt.err (!%p1562_p3)
}
  0x44   :  { %s1626_s3 = smov 128   ;;  %s1627_s28 = smov 8  }
  0x45   :  { %66 = dma.hbm_to_vmem [thread:$0]  %s1855_s5, 2048, %s61_s20, [#allocation10], %s1626_s3, %s1626_s3, %s1627_s28  }
  0x46   :  { %1610 = dma.done.wait [#allocation4], 64  }
  0x47   :  { %1611 = vsyncadd [#allocation4], 4294967232 }
  0x48   :  { %1612 = dma.done.wait [#allocation7], 7232  }
  0x49   :  { %1613 = vsyncadd [#allocation7], 4294960064 }
  0x4a   :  { %1614 = dma.done.wait [#allocation10], 2048  }
  0x4b   :  { %1615 = vsyncadd [#allocation10], 4294965248  ;;  %vm91_vm0 = vcmask 1048352   ;;  %v1628_v0 = vmov 0.0   ;;  %vm1629_vm1 = vmmov 0   ;;  %v1394_v1 = vld [vmem:[#allocation8] sm:$0xff]  }
  0x4c   :  { %1241 = vmatprep.subr.bf16.mxu0 %v1628_v0  ;;  %1257 = vmatprep.mubr.msk.bf16.mxu0 %vm1629_vm1, %v1628_v0  ;;  %92 = vst.msk [vmem:[#allocation2] sm:$0xff] %vm91_vm0, %v1628_v0  ;;  %v1395_v2 = vld [vmem:[#allocation8 + $0x8] sm:$0xff]   ;;  %v1396_v3 = vld [vmem:[#allocation8 + $0x10] sm:$0xff]   ;;  %v82_v4 = vld [vmem:[#allocation3] sm:$0xf]  ;;  %vm93_vm2 = vcmask 818176  }
  0x4d   :  { %1261 = vmatprep.subr.bf16.mxu1 %v1628_v0  ;;  %1277 = vmatprep.mubr.msk.bf16.mxu1 %vm1629_vm1, %v1628_v0  ;;  %v84_v5 = vld [vmem:[#allocation6] sm:$0xf]  ;;  %v86_v6 = vld [vmem:[%s1852_s2] sm:$0xf]  ;;  %v83_v7 = vunpack.c.l.bf16 %v82_v4  ;;  %v1402_v10 = vld [vmem:[#allocation8 + $0x40] sm:$0xff]   ;;  %s1631_s21 = smov [#allocation11]  }
  0x4e   :  { %1242 = vmatpush3.bf16.msra.mxu0 %v1394_v1  ;;  %v85_v8 = vunpack.c.l.bf16 %v84_v5  ;;  %v87_v9 = vunpack.c.l.bf16 %v86_v6  ;;  %v1397_v11 = vld [vmem:[#allocation8 + $0x18] sm:$0xff]   ;;  %1262 = vmatpush3.bf16.msra.mxu1 %v1402_v10  ;;  %v1403_v13 = vld [vmem:[#allocation8 + $0x48] sm:$0xff]   ;;  %v1398_v15 = vld [vmem:[#allocation8 + $0x20] sm:$0xff]   ;;  %v1630_v5 = vmov 0   ;;  %s1068_s22 = sshll.u32 %s1631_s21, 4  ;;  %vm826_vm3 = vcmask 814080   ;;  %s1069_s22 = int_to_ptr.vmem [resolvable:$true] %s1068_s22 }
  0x4f   :  { %1243 = vmatprep.subr.bf16.mxu0 %v1628_v0  ;;  %1263 = vmatprep.subr.bf16.mxu1 %v1628_v0  ;;  %v1404_v17 = vld [vmem:[#allocation8 + $0x50] sm:$0xff]   ;;  %v1399_v18 = vld [vmem:[#allocation8 + $0x28] sm:$0xff]   ;;  %v1405_v19 = vld [vmem:[#allocation8 + $0x58] sm:$0xff]   ;;  %s1566_s23 = scalar_lea.vmem %s1069_s22, 64  ;;  %p1571_p5 = scmp.lt.s32.totalorder %s1069_s22, %s1069_s22 }
  0x50   :  { %v88_v12 = vsub.f32 %v83_v7, %v85_v8  ;;  %v1400_v20 = vld [vmem:[#allocation8 + $0x30] sm:$0xff]   ;;  %v1406_v21 = vld [vmem:[#allocation8 + $0x60] sm:$0xff]   ;;  %v1401_v22 = vld [vmem:[#allocation8 + $0x38] sm:$0xff]   ;;  %p1567_p4 = scmp.ne.s32.totalorder %s1069_s22, %s1566_s23  ;;  %p1572_p6 = scmp.lt.s32.totalorder %s1566_s23, %s1566_s23 }
  0x51   :  { %v1407_v24 = vld [vmem:[#allocation8 + $0x68] sm:$0xff]   ;;  %v1408_v26 = vld [vmem:[#allocation8 + $0x70] sm:$0xff]   ;;  %v1409_v27 = vld [vmem:[#allocation8 + $0x78] sm:$0xff]  }
  0x52   :  { %1244 = vmatpush3.bf16.msra.mxu0 %v1395_v2  ;;  %v89_v14 = vmul.f32 %v88_v12, %v87_v9  ;;  %1264 = vmatpush3.bf16.msra.mxu1 %v1403_v13  ;;  %v1410_v28 = vld [vmem:[#allocation8 + $0x80] sm:$0xff]   ;;  %v1411_v29 = vld [vmem:[#allocation8 + $0x88] sm:$0xff]   ;;  %v1412_v30 = vld [vmem:[#allocation8 + $0x90] sm:$0xff]   ;;  %p1573_p7 = por %p1572_p6, %p1571_p5 }
  0x53   :  { %1245 = vmatprep.subr.bf16.mxu0 %v1628_v0  ;;  %1265 = vmatprep.subr.bf16.mxu1 %v1628_v0  ;;  %v1413_v31 = vld [vmem:[#allocation8 + $0x98] sm:$0xff]   ;;  %v1414_v32 = vld [vmem:[#allocation8 + $0xa0] sm:$0xff]   ;;  %v1415_v33 = vld [vmem:[#allocation8 + $0xa8] sm:$0xff]  }
  0x54   :  { %v90_v16 = vadd.f32 %v89_v14, %v85_v8  ;;  %v1093_v34 = vld [vmem:[%s1854_s4] ss:$0 sm:$0xff]  ;;  %v1416_v42 = vld [vmem:[#allocation8 + $0xb0] sm:$0xff]   ;;  %v1417_v43 = vld [vmem:[#allocation8 + $0xb8] sm:$0xff]   ;;  %p1574_p8 = pnand %p1573_p7, %p1567_p4 }
  0x55   :  { %v1418_v44 = vld [vmem:[#allocation9] ss:$8 sps:$4 sm:$0xff]   ;;  %v1420_v45 = vld [vmem:[#allocation9 + $0x4] ss:$8 sps:$4 sm:$0xff]   ;;  %v1423_v46 = vld [vmem:[#allocation9 + $0x14] ss:$8 sps:$4 sm:$0xff]  }
  0x56   :  { %1246 = vmatpush3.bf16.msra.mxu0 %v1396_v3  ;;  %94 = vst.msk [vmem:[#allocation2] sm:$0xff] %vm93_vm2, %v90_v16  ;;  %1266 = vmatpush3.bf16.msra.mxu1 %v1404_v17  ;;  %v1421_v47 = vld [vmem:[#allocation9 + $0x10] ss:$8 sps:$4 sm:$0xff]   ;;  %v1426_v48 = vld [vmem:[#allocation9 + $0x24] ss:$8 sps:$4 sm:$0xff]  }
  0x57   :  { %1247 = vmatprep.subr.bf16.mxu0 %v1628_v0  ;;  %1267 = vmatprep.subr.bf16.mxu1 %v1628_v0  ;;  %v1424_v49 = vld [vmem:[#allocation9 + $0x20] ss:$8 sps:$4 sm:$0xff]   ;;  %v1429_v50 = vld [vmem:[#allocation9 + $0x34] ss:$8 sps:$4 sm:$0xff]   ;;  %v1427_v51 = vld [vmem:[#allocation9 + $0x30] ss:$8 sps:$4 sm:$0xff]  }
  0x58   :  { %v1432_v52 = vld [vmem:[#allocation9 + $0x44] ss:$8 sps:$4 sm:$0xff]   ;;  %v1430_v53 = vld [vmem:[#allocation9 + $0x40] ss:$8 sps:$4 sm:$0xff]   ;;  %v1435_v54 = vld [vmem:[#allocation9 + $0x54] ss:$8 sps:$4 sm:$0xff]  }
  0x59   :  { %v1433_v55 = vld [vmem:[#allocation9 + $0x50] ss:$8 sps:$4 sm:$0xff]   ;;  %v1438_v56 = vld [vmem:[#allocation9 + $0x64] ss:$8 sps:$4 sm:$0xff]   ;;  %v1436_v57 = vld [vmem:[#allocation9 + $0x60] ss:$8 sps:$4 sm:$0xff]  }
  0x5a   :  { %1248 = vmatpush3.bf16.msra.mxu0 %v1397_v11  ;;  %1268 = vmatpush3.bf16.msra.mxu1 %v1405_v19  ;;  %v1103_v58 = vld [vmem:[%s1854_s4 + $0x1] ss:$0 sm:$0xff]  ;;  %v1441_v3 = vld [vmem:[#allocation9 + $0x74] ss:$8 sps:$4 sm:$0xff]   ;;  %v1439_v4 = vld [vmem:[#allocation9 + $0x70] ss:$8 sps:$4 sm:$0xff]  }
  0x5b   :  { %1249 = vmatprep.subr.bf16.mxu0 %v1628_v0  ;;  %1269 = vmatprep.subr.bf16.mxu1 %v1628_v0  ;;  %v1442_v6 = vld [vmem:[#allocation8 + $0xc0] sm:$0xff]   ;;  %v1443_v7 = vld [vmem:[#allocation8 + $0xc8] sm:$0xff]   ;;  %v1444_v8 = vld [vmem:[#allocation8 + $0xd0] sm:$0xff]  }
  0x5c   :  { %v1445_v9 = vld [vmem:[#allocation8 + $0xd8] sm:$0xff]   ;;  %v1446_v10 = vld [vmem:[#allocation8 + $0xe0] sm:$0xff]   ;;  %v1447_v11 = vld [vmem:[#allocation8 + $0xe8] sm:$0xff]  }
  0x5d   :  { %v95_v23 = vld [vmem:[#allocation2] sm:$0xff]  ;;  %v1113_v13 = vld [vmem:[%s1854_s4 + $0x2] ss:$0 sm:$0xff] }
  0x5e   :  { %1250 = vmatpush3.bf16.msra.mxu0 %v1398_v15  ;;  %1270 = vmatpush3.bf16.msra.mxu1 %v1406_v21  ;;  %v96_v25 = vpack.c.bf16 %v95_v23, %v95_v23  ;;  %v1448_v12 = vld [vmem:[#allocation8 + $0xf0] sm:$0xff]   ;;  %v1449_v21 = vld [vmem:[#allocation8 + $0xf8] sm:$0xff]   ;;  %v1459_v23 = vld [vmem:[#allocation8 + $0x108] sm:$0xff]  }
  0x5f   :  { %1251 = vmatprep.subr.bf16.mxu0 %v1628_v0  ;;  %1271 = vmatprep.subr.bf16.mxu1 %v1628_v0 }
  0x62   :  { %1252 = vmatpush3.bf16.msra.mxu0 %v1399_v18  ;;  %1272 = vmatpush3.bf16.msra.mxu1 %v1407_v24  ;;  %v1460_v24 = vld [vmem:[#allocation8 + $0x110] sm:$0xff]  }
  0x63   :  { %1253 = vmatprep.subr.bf16.mxu0 %v1628_v0  ;;  %1273 = vmatprep.subr.bf16.mxu1 %v1628_v0 }
  0x66   :  { %1254 = vmatpush3.bf16.msra.mxu0 %v1400_v20  ;;  %1274 = vmatpush3.bf16.msra.mxu1 %v1408_v26  ;;  %v1462_v26 = vld [vmem:[#allocation8 + $0x120] sm:$0xff]  }
  0x67   :  { %1255 = vmatprep.subr.bf16.mxu0 %v1628_v0  ;;  %1275 = vmatprep.subr.bf16.mxu1 %v1628_v0 }
  0x6a   :  { %1256 = vmatpush3.bf16.msra.mxu0 %v1401_v22  ;;  %1276 = vmatpush3.bf16.msra.mxu1 %v1409_v27  ;;  %v1458_v22 = vld [vmem:[#allocation8 + $0x100] sm:$0xff]   ;;  %v1463_v27 = vld [vmem:[#allocation8 + $0x128] sm:$0xff]  }
  0x6b   :  { %1281 = vmatprep.subr.bf16.mxu0 %v1628_v0  ;;  %548 = vmatprep.subr.bf16.mxu1 %v1420_v45  ;;  %v1454_v45 = vld [vmem:[#allocation8 + $0x160] sm:$0xff]  }
  0x6d   :  { %1258 = vmatmul.mubr.bf16.vlgmr.msra.gmra.mrb[0].mxu0 %v96_v25  ;;  %v1461_v25 = vld [vmem:[#allocation8 + $0x118] sm:$0xff]  }
  0x6e   :  { %1297 = vmatprep.mubr.msk.bf16.mxu0 %vm1629_vm1, %v1628_v0  ;;  %1282 = vmatpush3.bf16.msra.mxu0 %v1410_v28  ;;  %v1464_v28 = vld [vmem:[#allocation8 + $0x130] sm:$0xff]  }
  0x6f   :  { %1283 = vmatprep.subr.bf16.mxu0 %v1628_v0 }
  0x72   :  { %1284 = vmatpush3.bf16.msra.mxu0 %v1411_v29  ;;  %v458_v29 = vlaneseq }
  0x73   :  { %1285 = vmatprep.subr.bf16.mxu0 %v1628_v0 }
  0x76   :  { %1286 = vmatpush3.bf16.msra.mxu0 %v1412_v30  ;;  %v459_v30 = vshrl.u32 %v458_v29, 7 }
  0x77   :  { %1287 = vmatprep.subr.bf16.mxu0 %v1628_v0 }
  0x7a   :  { %1288 = vmatpush3.bf16.msra.mxu0 %v1413_v31  ;;  %v460_v31 = vsub.s32 0, %v459_v30 }
  0x7b   :  { %1289 = vmatprep.subr.bf16.mxu0 %v1628_v0 }
  0x7e   :  { %1290 = vmatpush3.bf16.msra.mxu0 %v1414_v32  ;;  %v456_v32 = vld [vmem:[%s1856_s6] sm:$0x3] }
  0x7f   :  { %1291 = vmatprep.subr.bf16.mxu0 %v1628_v0 }
  0x82   :  { %1292 = vmatpush3.bf16.msra.mxu0 %v1415_v33  ;;  %v461_v33 = vrot.slane %v456_v32, %v460_v31 }
  0x83   :  { %1293 = vmatprep.subr.bf16.mxu0 %v1628_v0 }
  0x86   :  { %1294 = vmatpush3.bf16.msra.mxu0 %v1416_v42  ;;  %v1451_v42 = vld [vmem:[#allocation8 + $0x148] sm:$0xff]  }
  0x87   :  { %1295 = vmatprep.subr.bf16.mxu0 %v1628_v0 }
  0x8a   :  { %1296 = vmatpush3.bf16.msra.mxu0 %v1417_v43  ;;  %v1452_v43 = vld [vmem:[#allocation8 + $0x150] sm:$0xff]  }
  0x8b   :  { %1301 = vmatprep.subr.bf16.mxu0 %v1628_v0 }
 0x140   :  { %v202_v35 = vpop.f32.mrb[0].mxu0 }
 0x141   :  { %v203_v36 = vadd.f32 %v1093_v34, %v202_v35  ;;  %v1259_v37 = vpop.f32.mrb[1].mxu0 }
 0x142   :  { %v205_v38 = vpop.f32.mrb[2].mxu0 }
 0x143   :  { %v208_v39 = vmax.f32 %v203_v36, 0.0  ;;  %v1260_v40 = vpop.f32.mrb[3].mxu0 }
 0x144   :  { %v1450_v40 = vld [vmem:[#allocation8 + $0x140] sm:$0xff]  }
 0x145   :  { %v209_v41 = vpack.c.bf16 %v208_v39, %v208_v39 }
 0x147   :  { %1278 = vmatmul.mubr.bf16.vlgmr.msra.gmra.mrb[0].mxu1 %v209_v41 }
 0x148   :  { %549 = vmatpush1.bf16.msra.mxu1 %v1418_v44  ;;  %580 = vmatprep.mubr.bf16.mxu1 %v1630_v5  ;;  %v1453_v44 = vld [vmem:[#allocation8 + $0x158] sm:$0xff]   ;;  %v1471_v5 = vld [vmem:[#allocation8 + $0x1a8] sm:$0xff]  }
 0x149   :  { %550 = vmatprep.subr.bf16.mxu1 %v1423_v46  ;;  %v464_v46 = vsub.s32 1, %v459_v30 }
 0x14c   :  { %551 = vmatpush1.bf16.msra.mxu1 %v1421_v47  ;;  %v1455_v47 = vld [vmem:[#allocation8 + $0x168] sm:$0xff]  }
 0x14d   :  { %552 = vmatprep.subr.bf16.mxu1 %v1426_v48  ;;  %v465_v48 = vrot.slane %v456_v32, %v464_v46 }
 0x150   :  { %553 = vmatpush1.bf16.msra.mxu1 %v1424_v49  ;;  %v1456_v49 = vld [vmem:[#allocation8 + $0x170] sm:$0xff]  }
 0x151   :  { %554 = vmatprep.subr.bf16.mxu1 %v1429_v50 }
 0x154   :  { %555 = vmatpush1.bf16.msra.mxu1 %v1427_v51  ;;  %v1457_v51 = vld [vmem:[#allocation8 + $0x178] sm:$0xff]  }
 0x155   :  { %556 = vmatprep.subr.bf16.mxu1 %v1432_v52 }
 0x158   :  { %557 = vmatpush1.bf16.msra.mxu1 %v1430_v53 }
 0x159   :  { %558 = vmatprep.subr.bf16.mxu1 %v1435_v54  ;;  %v1465_v54 = vld [vmem:[#allocation8 + $0x138] sm:$0xff]  }
 0x15c   :  { %559 = vmatpush1.bf16.msra.mxu1 %v1433_v55  ;;  %v1139_v55 = vld [vmem:[%s1854_s4 + $0x3] ss:$0 sm:$0xff] }
 0x15d   :  { %560 = vmatprep.subr.bf16.mxu1 %v1438_v56 }
 0x160   :  { %561 = vmatpush1.bf16.msra.mxu1 %v1436_v57 }
 0x161   :  { %562 = vmatprep.subr.bf16.mxu1 %v1441_v3  ;;  %v1469_v3 = vld [vmem:[#allocation8 + $0x198] sm:$0xff]  }
 0x164   :  { %563 = vmatpush1.bf16.msra.mxu1 %v1439_v4  ;;  %v1470_v4 = vld [vmem:[#allocation8 + $0x1a0] sm:$0xff]  }
 0x165   :  { %1321 = vmatprep.subr.bf16.mxu1 %v1628_v0 }
 0x21a   :  { %v317_v59 = vpop.f32.mrb[0].mxu1 }
 0x21b   :  { %v318_v60 = vadd.f32 %v1103_v58, %v317_v59  ;;  %v1279_v61 = vpop.f32.mrb[1].mxu1 }
 0x21c   :  { %v320_v62 = vpop.f32.mrb[2].mxu1 }
 0x21d   :  { %v323_v63 = vmax.f32 %v318_v60, 0.0  ;;  %v1280_v1 = vpop.f32.mrb[3].mxu1  ;;  %v1466_v62 = vld [vmem:[#allocation8 + $0x180] sm:$0xff]  }
 0x21e   :  { %v1467_v1 = vld [vmem:[#allocation8 + $0x188] sm:$0xff]  }
 0x21f   :  { %v324_v2 = vpack.c.bf16 %v323_v63, %v323_v63 }
 0x221   :  { %1298 = vmatmul.mubr.bf16.vlgmr.msra.gmra.mrb[4].mxu0 %v324_v2  ;;  %v1468_v2 = vld [vmem:[#allocation8 + $0x190] sm:$0xff]  }
 0x222   :  { %1317 = vmatprep.mubr.msk.bf16.mxu0 %vm1629_vm1, %v1628_v0  ;;  %1302 = vmatpush3.bf16.msra.mxu0 %v1442_v6  ;;  %v1472_v6 = vld [vmem:[#allocation8 + $0x1b0] sm:$0xff]  }
 0x223   :  { %1303 = vmatprep.subr.bf16.mxu0 %v1628_v0 }
 0x226   :  { %1304 = vmatpush3.bf16.msra.mxu0 %v1443_v7  ;;  %v1159_v7 = vld [vmem:[%s1854_s4 + $0x5] ss:$0 sm:$0xff] }
 0x227   :  { %1305 = vmatprep.subr.bf16.mxu0 %v1628_v0 }
 0x22a   :  { %1306 = vmatpush3.bf16.msra.mxu0 %v1444_v8 }
 0x22b   :  { %1307 = vmatprep.subr.bf16.mxu0 %v1628_v0 }
 0x22e   :  { %1308 = vmatpush3.bf16.msra.mxu0 %v1445_v9  ;;  %v1473_v9 = vld [vmem:[#allocation8 + $0x1b8] sm:$0xff]  }
 0x22f   :  { %1309 = vmatprep.subr.bf16.mxu0 %v1628_v0 }
 0x232   :  { %1310 = vmatpush3.bf16.msra.mxu0 %v1446_v10 }
 0x233   :  { %1311 = vmatprep.subr.bf16.mxu0 %v1628_v0 }
 0x236   :  { %1312 = vmatpush3.bf16.msra.mxu0 %v1447_v11 }
 0x237   :  { %1313 = vmatprep.subr.bf16.mxu0 %v1628_v0 }
 0x23a   :  { %1314 = vmatpush3.bf16.msra.mxu0 %v1448_v12 }
 0x23b   :  { %1315 = vmatprep.subr.bf16.mxu0 %v1628_v0 }
 0x23e   :  { %1316 = vmatpush3.bf16.msra.mxu0 %v1449_v21 }
 0x23f   :  { %1341 = vmatprep.subr.bf16.mxu0 %v1628_v0 }
 0x2f4   :  { %v432_v14 = vpop.f32.mrb[4].mxu0 }
 0x2f5   :  { %v433_v15 = vadd.f32 %v1113_v13, %v432_v14  ;;  %v1299_v16 = vpop.f32.mrb[5].mxu0 }
 0x2f6   :  { %v435_v17 = vpop.f32.mrb[6].mxu0  ;;  %v1149_v16 = vld [vmem:[%s1854_s4 + $0x4] ss:$0 sm:$0xff] }
 0x2f7   :  { %v438_v18 = vmax.f32 %v433_v15, 0.0  ;;  %v1300_v19 = vpop.f32.mrb[7].mxu0 }
 0x2f9   :  { %v439_v20 = vpack.c.bf16 %v438_v18, %v438_v18 }
 0x2fb   :  { %581 = vmatmul.mubr.bf16.vlgmr.msra.gmra.mrb[4].mxu1 %v439_v20 }
 0x2fc   :  { %1337 = vmatprep.mubr.msk.bf16.mxu1 %vm1629_vm1, %v1628_v0  ;;  %1322 = vmatpush3.bf16.msra.mxu1 %v1458_v22 }
 0x2fd   :  { %1323 = vmatprep.subr.bf16.mxu1 %v1628_v0 }
 0x300   :  { %1324 = vmatpush3.bf16.msra.mxu1 %v1459_v23 }
 0x301   :  { %1325 = vmatprep.subr.bf16.mxu1 %v1628_v0 }
 0x304   :  { %1326 = vmatpush3.bf16.msra.mxu1 %v1460_v24 }
 0x305   :  { %1327 = vmatprep.subr.bf16.mxu1 %v1628_v0 }
 0x308   :  { %1328 = vmatpush3.bf16.msra.mxu1 %v1461_v25 }
 0x309   :  { %1329 = vmatprep.subr.bf16.mxu1 %v1628_v0 }
 0x30c   :  { %1330 = vmatpush3.bf16.msra.mxu1 %v1462_v26 }
 0x30d   :  { %1331 = vmatprep.subr.bf16.mxu1 %v1628_v0 }
 0x310   :  { %1332 = vmatpush3.bf16.msra.mxu1 %v1463_v27 }
 0x311   :  { %1333 = vmatprep.subr.bf16.mxu1 %v1628_v0 }
 0x314   :  { %1334 = vmatpush3.bf16.msra.mxu1 %v1464_v28 }
 0x315   :  { %1335 = vmatprep.subr.bf16.mxu1 %v1628_v0 }
 0x318   :  { %1336 = vmatpush3.bf16.msra.mxu1 %v1465_v54 }
 0x319   :  { %1361 = vmatprep.subr.bf16.mxu1 %v1628_v0 }
 0x3ce   :  { %v582_v34 = vpop.f32.mrb[4].mxu1 }
 0x3cf   :  { %v583_v35 = vadd.f32 %v582_v34, %v461_v33  ;;  %v584_v36 = vpop.f32.mrb[5].mxu1 }
 0x3d0   :  { %v586_v37 = vpop.f32.mrb[6].mxu1  ;;  %v585_v50 = vadd.f32 %v584_v36, %v465_v48 }
 0x3d1   :  { %v589_v38 = vmax.f32 %v583_v35, 0.0  ;;  %v587_v39 = vpop.f32.mrb[7].mxu1 }
 0x3d2   :  { %v590_v52 = vmax.f32 %v585_v50, 0.0 }
 0x3d3   :  { %v591_v41 = vpack.c.bf16 %v589_v38, %v589_v38 }
 0x3d4   :  { %v592_v53 = vpack.c.bf16 %v590_v52, %v590_v52 }
 0x3d5   :  { %1318 = vmatmul.mubr.bf16.vlgmr.msra.gmra.mrb[8].mxu0 %v591_v41 }
 0x3d6   :  { %1342 = vmatpush3.bf16.msra.mxu0 %v1450_v40  ;;  %1357 = vmatprep.mubr.msk.bf16.mxu0 %vm1629_vm1, %v1628_v0 }
 0x3d7   :  { %1343 = vmatprep.subr.bf16.mxu0 %v1628_v0 }
 0x3da   :  { %1344 = vmatpush3.bf16.msra.mxu0 %v1451_v42 }
 0x3db   :  { %1345 = vmatprep.subr.bf16.mxu0 %v1628_v0 }
 0x3de   :  { %1346 = vmatpush3.bf16.msra.mxu0 %v1452_v43 }
 0x3df   :  { %1347 = vmatprep.subr.bf16.mxu0 %v1628_v0 }
 0x3e2   :  { %1348 = vmatpush3.bf16.msra.mxu0 %v1453_v44 }
 0x3e3   :  { %1349 = vmatprep.subr.bf16.mxu0 %v1628_v0 }
 0x3e6   :  { %1350 = vmatpush3.bf16.msra.mxu0 %v1454_v45 }
 0x3e7   :  { %1351 = vmatprep.subr.bf16.mxu0 %v1628_v0 }
 0x3ea   :  { %1352 = vmatpush3.bf16.msra.mxu0 %v1455_v47 }
 0x3eb   :  { %1353 = vmatprep.subr.bf16.mxu0 %v1628_v0 }
 0x3ee   :  { %1354 = vmatpush3.bf16.msra.mxu0 %v1456_v49 }
 0x3ef   :  { %1355 = vmatprep.subr.bf16.mxu0 %v1628_v0 }
 0x3f2   :  { %1356 = vmatpush3.bf16.msra.mxu0 %v1457_v51 }
 0x3f5   :  { %1358 = vmatmul.mubr.bf16.vlgmr.msra.gmra.mrb[12].mxu0 %v592_v53 }
 0x4a8   :  { %v700_v56 = vpop.f32.mrb[8].mxu0 }
 0x4a9   :  { %v701_v57 = vadd.f32 %v1139_v55, %v700_v56  ;;  %v1319_v58 = vpop.f32.mrb[9].mxu0 }
 0x4aa   :  { %v703_v59 = vpop.f32.mrb[10].mxu0 }
 0x4ab   :  { %v706_v60 = vmax.f32 %v701_v57, 0.0  ;;  %v1320_v61 = vpop.f32.mrb[11].mxu0 }
 0x4ad   :  { %v707_v63 = vpack.c.bf16 %v706_v60, %v706_v60 }
 0x4af   :  { %1338 = vmatmul.mubr.bf16.vlgmr.msra.gmra.mrb[8].mxu1 %v707_v63 }
 0x4b0   :  { %1362 = vmatpush3.bf16.msra.mxu1 %v1466_v62  ;;  %1377 = vmatprep.mubr.msk.bf16.mxu1 %vm1629_vm1, %v1628_v0 }
 0x4b1   :  { %1363 = vmatprep.subr.bf16.mxu1 %v1628_v0 }
 0x4b4   :  { %1364 = vmatpush3.bf16.msra.mxu1 %v1467_v1 }
 0x4b5   :  { %1365 = vmatprep.subr.bf16.mxu1 %v1628_v0 }
 0x4b8   :  { %1366 = vmatpush3.bf16.msra.mxu1 %v1468_v2 }
 0x4b9   :  { %1367 = vmatprep.subr.bf16.mxu1 %v1628_v0 }
 0x4bc   :  { %1368 = vmatpush3.bf16.msra.mxu1 %v1469_v3 }
 0x4bd   :  { %1369 = vmatprep.subr.bf16.mxu1 %v1628_v0 }
 0x4c0   :  { %1370 = vmatpush3.bf16.msra.mxu1 %v1470_v4 }
 0x4c1   :  { %1371 = vmatprep.subr.bf16.mxu1 %v1628_v0 }
 0x4c4   :  { %1372 = vmatpush3.bf16.msra.mxu1 %v1471_v5 }
 0x4c5   :  { %1373 = vmatprep.subr.bf16.mxu1 %v1628_v0 }
 0x4c8   :  { %v935_v8 = vpop.f32.mrb[12].mxu0  ;;  %1374 = vmatpush3.bf16.msra.mxu1 %v1472_v6 }
 0x4c9   :  { %v936_v10 = vadd.f32 %v1159_v7, %v935_v8  ;;  %v1359_v11 = vpop.f32.mrb[13].mxu0  ;;  %1375 = vmatprep.subr.bf16.mxu1 %v1628_v0 }
 0x4ca   :  { %v938_v12 = vpop.f32.mrb[14].mxu0 }
 0x4cb   :  { %v941_v13 = vmax.f32 %v936_v10, 0.0  ;;  %v1360_v14 = vpop.f32.mrb[15].mxu0 }
 0x4cc   :  { %1376 = vmatpush3.bf16.msra.mxu1 %v1473_v9 }
 0x4cd   :  { %v942_v15 = vpack.c.bf16 %v941_v13, %v941_v13 }
 0x4cf   :  { %1378 = vmatmul.mubr.bf16.vlgmr.msra.gmra.mrb[12].mxu1 %v942_v15 }
 0x582   :  { %v815_v17 = vpop.f32.mrb[8].mxu1 }
 0x583   :  { %v816_v18 = vadd.f32 %v1149_v16, %v815_v17  ;;  %v1339_v19 = vpop.f32.mrb[9].mxu1 }
 0x584   :  { %v818_v20 = vpop.f32.mrb[10].mxu1 }
 0x585   :  { %v821_v21 = vmul.f32 0.5, %v816_v18  ;;  %v1340_v22 = vpop.f32.mrb[11].mxu1 }
 0x587   :  { %1474 = vtanh.f32 %v821_v21 }
 0x591   :  { %v1475_v23 = vpop.eup %1474 }
 0x592   :  { %v823_v24 = vmul.f32 0.5, %v1475_v23 }
 0x594   :  { %v824_v0 = vadd.f32 0.5, %v823_v24 }
 0x596   :  { %v825_v25 = vpack.c.bf16 %v824_v0, %v824_v0 }
 0x598   :  { %827 = vst.msk [vmem:[#allocation11] sm:$0xf] %vm826_vm3, %v825_v25 }
 0x599   :  { %1577 = shalt.err (!%p1574_p8)
}
 0x59a   :  { %s1578_s26 = scalar_lea.hbm %s1857_s7, 64 }
 0x59b   :  { %p1579_p9 = scmp.ne.s32.totalorder %s1857_s7, %s1578_s26  ;;  %p1582_p10 = scmp.lt.u32.totalorder %s1578_s26, %s1857_s7 }
 0x59d   :  { %p1584_p11 = pnand %p1582_p10, %p1579_p9 }
 0x59f   :  { %1587 = shalt.err (!%p1584_p11)
}
 0x5a0   :  { %1071 = dma.vmem_to_hbm [thread:$0]  %s1069_s22, 64, %s1857_s7, [#allocation5]   ;;  %v1169_v26 = vld [vmem:[%s1854_s4 + $0x6] ss:$0 sm:$0xff] }
 0x5a1   :  { %s1632_s2 = smov [#allocation12]  }
 0x5a2   :  { %v1050_v27 = vpop.f32.mrb[12].mxu1  ;;  %s1078_s11 = sshll.u32 %s1632_s2, 4  ;;  %s1079_s11 = int_to_ptr.vmem [resolvable:$true] %s1078_s11 }
 0x5a3   :  { %v1051_v28 = vadd.f32 %v1169_v26, %v1050_v27  ;;  %v1379_v29 = vpop.f32.mrb[13].mxu1  ;;  %s1588_s7 = scalar_lea.vmem %s1079_s11, 64  ;;  %p1593_p13 = scmp.lt.s32.totalorder %s1079_s11, %s1079_s11 }
 0x5a4   :  { %v1053_v30 = vpop.f32.mrb[14].mxu1  ;;  %p1589_p12 = scmp.ne.s32.totalorder %s1079_s11, %s1588_s7  ;;  %p1594_p0 = scmp.lt.s32.totalorder %s1588_s7, %s1588_s7 }
 0x5a5   :  { %v1056_v31 = vmul.f32 0.5, %v1051_v28  ;;  %v1380_v32 = vpop.f32.mrb[15].mxu1 }
 0x5a6   :  { %p1595_p1 = por %p1594_p0, %p1593_p13 }
 0x5a7   :  { %1476 = vtanh.f32 %v1056_v31 }
 0x5a8   :  { %p1596_p2 = pnand %p1595_p1, %p1589_p12 }
 0x5b1   :  { %v1477_v33 = vpop.eup %1476 }
 0x5b2   :  { %v1058_v34 = vmul.f32 0.5, %v1477_v33 }
 0x5b4   :  { %v1059_v35 = vadd.f32 0.5, %v1058_v34 }
 0x5b6   :  { %v1060_v36 = vpack.c.bf16 %v1059_v35, %v1059_v35 }
 0x5b8   :  { %1061 = vst.msk [vmem:[#allocation12] sm:$0xf] %vm826_vm3, %v1060_v36 }
 0x5b9   :  { %1599 = shalt.err (!%p1596_p2)
}
 0x5ba   :  { %s1600_s13 = scalar_lea.hbm %s1858_s8, 64 }
 0x5bb   :  { %p1601_p3 = scmp.ne.s32.totalorder %s1858_s8, %s1600_s13  ;;  %p1604_p4 = scmp.lt.u32.totalorder %s1600_s13, %s1858_s8 }
 0x5bd   :  { %p1606_p5 = pnand %p1604_p4, %p1601_p3 }
 0x5bf   :  { %1609 = shalt.err (!%p1606_p5)
}
 0x5c0   :  { %1081 = dma.vmem_to_hbm [thread:$0]  %s1079_s11, 64, %s1858_s8, [#allocation13]  }
 0x5c1   :  { %1616 = dma.done.wait [#allocation5], 64  }
 0x5c2   :  { %1617 = vsyncadd [#allocation5], 4294967232 }
 0x5c3   :  { %1618 = dma.done.wait [#allocation13], 64  }
 0x5c4   :  { %1619 = vsyncadd [#allocation13], 4294967232 }
 0x5c5   :  { %1088 = vsyncpa [#allocation4], 1 }
 0x5c6   :  { %1089 = vsyncpa [#allocation7], 1 }
 0x5c7   :  { %1090 = vsyncpa [#allocation10], 1 }
 0x5c8   :  { %1091 = vsyncpa [#allocation5], 1 }
 0x5c9   :  { %1092 = vsyncpa [#allocation13], 1 }

</bundles_post_ra>
